<compile_context>
chip_gen: v7x
topology: tpu7x:2x2x1
jax: 0.10.0
libtpu: 0.0.40
codegen_flags: <defaults>
</compile_context>

<pallas_src>
import functools

import jax
import jax.numpy as jnp
from jax import lax
from jax.experimental import pallas as pl
from jax.experimental.pallas import tpu as pltpu


_LANES = 128
# Per input, per pipeline buffer.  2 inputs x 2 buffers x 4 MiB = 16 MiB of
# block traffic -> comfortably under the 32 MiB scoped-VMEM limit below.
_TARGET_BLOCK_BYTES = 4 * 1024 * 1024
# Keep this explicit: v5e's *default* scoped VMEM is only 16 MiB (128 MiB
# physical), and on v7x 32 MiB is the practical hard ceiling (64 MiB physical),
# so do NOT raise it toward v6e-style 64-96 MiB tunings.
_VMEM_LIMIT_BYTES = 32 * 1024 * 1024


def _ipow(x, p):
    """x**p without the float-exponent (exp/log via EUP) path for integer p."""
    if float(p) == 2.0:
        return x * x
    if float(p) == int(p):
        return lax.integer_pow(x, int(p))
    return x ** p  # genuinely fractional p: transcendental, matches torch.pow


# -----------------------------------------------------------------------------
# Kernel 1: whole samples fit in one block -> reduce the feature axis in-kernel.
# Works for both layouts:
#   * 3-D blocks (tile_b, r, 128)  -> partial (tile_b, 1, 128)  (sublane reduce)
#   * 2-D blocks (tile_b, F)       -> partial (tile_b, 1)       (lane reduce)
# -----------------------------------------------------------------------------
def _dice_sample_kernel(pred_ref, targ_ref, num_ref, den_ref, *, p):
    pred = pred_ref[...].astype(jnp.float32)
    targ = targ_ref[...].astype(jnp.float32)
    num_ref[...] = jnp.sum(pred * targ, axis=1, keepdims=True)
    den_ref[...] = jnp.sum(_ipow(pred, p) + _ipow(targ, p), axis=1, keepdims=True)


def _dice_partials_samples(pred3d, targ3d, *, p, budget_rows):
    """Path A: F % 128 == 0 and whole samples fit a block (possibly several)."""
    n, r, lanes = pred3d.shape
    # Pack samples per block until the DMA target is met (review #6)...
    tile_b = max(1, min(n, budget_rows // max(r, 1)))
    if tile_b >= n and n >= 2:
        # ...but keep >= 2 batch blocks so both TensorCores get work and the
        # DMA of step i+1 can overlap the compute of step i.
        tile_b = pl.cdiv(n, 2)
    grid = (pl.cdiv(n, tile_b),)

    num, den = pl.pallas_call(
        functools.partial(_dice_sample_kernel, p=p),
        out_shape=(jax.ShapeDtypeStruct((n, 1, lanes), jnp.float32),) * 2,
        grid_spec=pltpu.PrefetchScalarGridSpec(
            num_scalar_prefetch=0,
            grid=grid,
            in_specs=[pl.BlockSpec((tile_b, r, lanes), lambda b: (b, 0, 0))] * 2,
            out_specs=[pl.BlockSpec((tile_b, 1, lanes), lambda b: (b, 0, 0))] * 2,
        ),
        compiler_params=pltpu.CompilerParams(
            dimension_semantics=("parallel",),
            vmem_limit_bytes=_VMEM_LIMIT_BYTES,
        ),
    )(pred3d, targ3d)
    return num, den


def _dice_partials_flat(pred2d, targ2d, *, p, tile_b):
    """Path A2: F % 128 != 0 -> keep the natural (N, F) layout, no host pad."""
    n, f = pred2d.shape
    grid = (pl.cdiv(n, tile_b),)

    num, den = pl.pallas_call(
        functools.partial(_dice_sample_kernel, p=p),
        out_shape=(jax.ShapeDtypeStruct((n, 1), jnp.float32),) * 2,
        grid_spec=pltpu.PrefetchScalarGridSpec(
            num_scalar_prefetch=0,
            grid=grid,
            # Last block dim == full F, so a ragged feature count needs no pad;
            # tile_b is either the full batch or a multiple of 8 (sublane rule).
            in_specs=[pl.BlockSpec((tile_b, f), lambda b: (b, 0))] * 2,
            out_specs=[pl.BlockSpec((tile_b, 1), lambda b: (b, 0))] * 2,
        ),
        compiler_params=pltpu.CompilerParams(
            dimension_semantics=("parallel",),
            vmem_limit_bytes=_VMEM_LIMIT_BYTES,
        ),
    )(pred2d, targ2d)
    return num, den


# -----------------------------------------------------------------------------
# Kernel 2: large samples -> tile the row axis, accumulate lane-dense partials
# that stay VMEM-resident across the ("arbitrary", innermost) row sweep.
# -----------------------------------------------------------------------------
def _dice_tiled_kernel(pred_ref, targ_ref, num_ref, den_ref, *,
                       p, valid_rows, tile_r, acc_rows, tiles_per_chunk):
    c = pl.program_id(1)
    k = pl.program_id(2)

    # Output blocks are resident across the row-tile sweep of this (b, c);
    # zero them when the sweep starts.
    @pl.when(k == 0)
    def _():
        num_ref[...] = jnp.zeros_like(num_ref)
        den_ref[...] = jnp.zeros_like(den_ref)

    start = (c * tiles_per_chunk + k) * tile_r

    def _accumulate(mask_rows):
        pred = pred_ref[0].astype(jnp.float32)       # (tile_r, 128)
        targ = targ_ref[0].astype(jnp.float32)
        if mask_rows:
            # Boundary tile only: zero the out-of-range rows (zeros contribute
            # nothing to either sum for p > 0).  Masked BEFORE any arithmetic
            # so garbage (even NaN) never reaches the sums.
            row = start + lax.broadcasted_iota(jnp.int32, pred.shape, 0)
            keep = row < valid_rows
            pred = jnp.where(keep, pred, 0.0)
            targ = jnp.where(keep, targ, 0.0)
        prod = pred * targ                           # VPU
        powsum = _ipow(pred, p) + _ipow(targ, p)     # VPU (p=2: no EUP work)
        # Fold rows onto a wide (acc_rows, 128) accumulator with plain vreg
        # adds: acc_rows = 32 -> 4 independent add chains per sum (VALU ILP),
        # no XLU in the hot loop; the single cross-lane reduce happens in JAX.
        folds = tile_r // acc_rows
        num_ref[0, 0] += jnp.sum(prod.reshape(folds, acc_rows, _LANES), axis=0)
        den_ref[0, 0] += jnp.sum(powsum.reshape(folds, acc_rows, _LANES), axis=0)

    # Gate the ragged-row mask: every fully-in-range tile runs the unmasked
    # path; only the final (boundary) tile pays for iota/compare/select.
    is_full = start + tile_r <= valid_rows

    @pl.when(is_full)
    def _():
        _accumulate(False)

    @pl.when(jnp.logical_not(is_full))
    def _():
        _accumulate(True)


def _dice_partials_tiled(pred3d, targ3d, *, p, budget_rows):
    """Path B: F % 128 == 0 and r > budget_rows -> row-tiled accumulation."""
    n, r, lanes = pred3d.shape
    tile_r = max(8, (min(budget_rows, r) // 8) * 8)
    acc_rows = 32 if tile_r % 32 == 0 else 8
    total_tiles = pl.cdiv(r, tile_r)

    n_chunks = 1
    if n == 1 and total_tiles >= 2:
        # Single-sample batch: split the row sweep into two "parallel" chunks
        # so the second TensorCore is not idle (v7x: HBM BW is per-TC).
        if total_tiles % 2 != 0:
            # Nudge the tile size toward an even tile count; never generates a
            # block index past the array (guarded by the evenness check).
            alt = max(8, ((pl.cdiv(r, total_tiles + 1) + 7) // 8) * 8)
            if pl.cdiv(r, alt) % 2 == 0:
                tile_r = alt
                acc_rows = 32 if tile_r % 32 == 0 else 8
                total_tiles = pl.cdiv(r, tile_r)
        if total_tiles % 2 == 0:
            n_chunks = 2
    tiles_per_chunk = total_tiles // n_chunks

    kernel = functools.partial(
        _dice_tiled_kernel, p=p, valid_rows=r, tile_r=tile_r,
        acc_rows=acc_rows, tiles_per_chunk=tiles_per_chunk)

    num, den = pl.pallas_call(
        kernel,
        out_shape=(jax.ShapeDtypeStruct((n, n_chunks, acc_rows, lanes),
                                        jnp.float32),) * 2,
        grid_spec=pltpu.PrefetchScalarGridSpec(
            num_scalar_prefetch=0,
            grid=(n, n_chunks, tiles_per_chunk),
            in_specs=[pl.BlockSpec(
                (1, tile_r, lanes),
                lambda b, c, k: (b, c * tiles_per_chunk + k, 0))] * 2,
            out_specs=[pl.BlockSpec(
                (1, 1, acc_rows, lanes),
                lambda b, c, k: (b, c, 0, 0))] * 2,
        ),
        compiler_params=pltpu.CompilerParams(
            # Batch & chunk axes shard across TensorCores; each (b, c) owns its
            # output block, so there is no cross-core race.  The row-tile sweep
            # is the accumulation axis -> "arbitrary", innermost.
            dimension_semantics=("parallel", "parallel", "arbitrary"),
            vmem_limit_bytes=_VMEM_LIMIT_BYTES,
        ),
    )(pred3d, targ3d)
    return num, den


# -----------------------------------------------------------------------------
# Public wrapper: BinaryDiceLoss.forward
# -----------------------------------------------------------------------------
def binary_dice_loss(predict, target, *, smooth=1.0, p=2, reduction="mean",
                     tile_rows=None):
    """Pallas implementation of BinaryDiceLoss(smooth, p, reduction)."""
    assert predict.shape[0] == target.shape[0], \
        "predict & target batch size don't match"
    # The zero-padding / zero-masking of out-of-range elements requires
    # x**p == 0 for x == 0, i.e. p > 0 (the module's default p=2 qualifies).
    assert float(p) > 0, "binary_dice_loss requires p > 0"

    n = predict.shape[0]
    pred2d = predict.reshape(n, -1)     # same memory order as torch .view(N,-1)
    targ2d = target.reshape(n, -1)
    f = pred2d.shape[1]
    itemsize = max(jnp.dtype(pred2d.dtype).itemsize,
                   jnp.dtype(targ2d.dtype).itemsize)

    if tile_rows is None:
        # dtype-aware per-step DMA target: 8192 rows (f32) / 16384 rows (bf16)
        # of 128 lanes per input per pipeline buffer (~4 MiB each).
        budget_rows = max(32, _TARGET_BLOCK_BYTES // (_LANES * itemsize))
    else:
        budget_rows = max(8, int(tile_rows))

    num_part = den_part = None

    if f % _LANES != 0:
        # Ragged feature tail: keep the natural (N, F) layout (batch on the
        # sublane axis, features on lanes).  No host-side jnp.pad -> no extra
        # HBM round trip of both inputs.
        if n <= 8:
            tile_b = n                                  # full batch dim
        else:
            want = max(1, (budget_rows * _LANES) // max(f, 1))
            tile_b = n if want >= n else max(8, (want // 8) * 8)
        block_bytes = 2 * 2 * tile_b * f * itemsize     # 2 inputs x 2 buffers
        if block_bytes <= 24 * 1024 * 1024:
            num_part, den_part = _dice_partials_flat(
                pred2d, targ2d, p=p, tile_b=tile_b)
        else:
            # TODO(synk): row-tile the huge ragged-F case in-kernel (lane mask
            # on the final 128-wide row of each sample) instead of this pad.
            f_pad = pl.cdiv(f, _LANES) * _LANES
            pred2d = jnp.pad(pred2d, ((0, 0), (0, f_pad - f)))
            targ2d = jnp.pad(targ2d, ((0, 0), (0, f_pad - f)))
            f = f_pad

    if num_part is None:
        r = f // _LANES
        # Copy-free row-major refold: (N, F) -> (N, R, 128); feature rows fill
        # both sublanes and lanes of every vreg / DMA tile.  Inputs keep their
        # original dtype (bf16 stays bf16 -> half the HBM traffic).
        pred3d = pred2d.reshape(n, r, _LANES)
        targ3d = targ2d.reshape(n, r, _LANES)
        if r <= budget_rows:
            num_part, den_part = _dice_partials_samples(
                pred3d, targ3d, p=p, budget_rows=budget_rows)
        else:
            num_part, den_part = _dice_partials_tiled(
                pred3d, targ3d, p=p, budget_rows=budget_rows)

    # Tiny epilogue on the per-sample partials (at most a few KB per sample).
    num = num_part.reshape(n, -1).sum(axis=1) + smooth
    den = den_part.reshape(n, -1).sum(axis=1) + smooth
    loss = 1.0 - num / den                              # (N,) per-sample loss

    if reduction == "mean":
        return jnp.mean(loss)
    elif reduction == "sum":
        return jnp.sum(loss)
    elif reduction == "none":
        return loss
    else:
        raise Exception("Unexpected reduction {}".format(reduction))


def _reference(predict, target, smooth=1.0, p=2, reduction="mean"):
    n = predict.shape[0]
    pr = predict.reshape(n, -1).astype(jnp.float32)
    tg = target.reshape(n, -1).astype(jnp.float32)
    num = jnp.sum(pr * tg, axis=1) + smooth
    den = jnp.sum(pr ** p + tg ** p, axis=1) + smooth
    loss = 1.0 - num / den
    if reduction == "mean":
        return jnp.mean(loss)
    if reduction == "sum":
        return jnp.sum(loss)
    return loss


if __name__ == "__main__":
    key = jax.random.PRNGKey(0)
    keys = jax.random.split(key, 12)

    def check(name, predict, target, *, reduction="mean", tile_rows=None,
              tol=1e-5):
        out = binary_dice_loss(predict, target, smooth=1.0, p=2,
                               reduction=reduction, tile_rows=tile_rows)
        out = jax.block_until_ready(out)
        ref = _reference(predict, target, smooth=1.0, p=2, reduction=reduction)
        assert jnp.allclose(out, ref, rtol=tol, atol=tol), (name, out, ref)

    # 1) Main case [N, C, H, W] = [2, 4, 16, 16] (F=1024 -> whole-sample path).
    pr = jax.nn.sigmoid(jax.random.normal(keys[0], (2, 4, 16, 16), jnp.float32))
    tg = (jax.random.uniform(keys[1], (2, 4, 16, 16)) > 0.5).astype(jnp.float32)
    check("mean", pr, tg)

    # 2) Row-tiled path with a gated ragged tail tile (F=1280 -> r=10, tile=8),
    #    reduction='none'.
    pr2 = jax.nn.sigmoid(jax.random.normal(keys[2], (3, 5, 16, 16), jnp.float32))
    tg2 = (jax.random.uniform(keys[3], (3, 5, 16, 16)) > 0.5).astype(jnp.float32)
    check("tiled", pr2, tg2, reduction="none", tile_rows=8)

    # 3) Multiple samples per block with a ragged batch tile (N=5 -> tile_b=3).
    pr3 = jax.nn.sigmoid(jax.random.normal(keys[4], (5, 4, 16, 16), jnp.float32))
    tg3 = (jax.random.uniform(keys[5], (5, 4, 16, 16)) > 0.5).astype(jnp.float32)
    check("batch-tiled", pr3, tg3, reduction="sum")

    # 4) Ragged feature count (F=243, not a multiple of 128): no-pad 2-D path.
    pr4 = jax.nn.sigmoid(jax.random.normal(keys[6], (2, 3, 9, 9), jnp.float32))
    tg4 = (jax.random.uniform(keys[7], (2, 3, 9, 9)) > 0.5).astype(jnp.float32)
    check("ragged-F", pr4, tg4)

    # 5) Single-sample batch: row sweep split into two parallel chunks.
    pr5 = jax.nn.sigmoid(jax.random.normal(keys[8], (1, 8, 64, 64), jnp.float32))
    tg5 = (jax.random.uniform(keys[9], (1, 8, 64, 64)) > 0.5).astype(jnp.float32)
    check("chunked", pr5, tg5, reduction="none", tile_rows=32)

    # 6) bf16 inputs (kernel upcasts to f32; HBM traffic halves).
    pr6 = jax.nn.sigmoid(
        jax.random.normal(keys[10], (2, 4, 16, 16))).astype(jnp.bfloat16)
    tg6 = (jax.random.uniform(keys[11], (2, 4, 16, 16)) > 0.5
           ).astype(jnp.bfloat16)
    check("bf16", pr6, tg6, tol=1e-4)

    print("KERNEL_OK")
</pallas_src>

<mosaic_0001>
module attributes {stable_mosaic.version = 11 : i64} {
  func.func @_dice_sample_kernel(%arg0: i32, %arg1: memref<1x8x128xf32, #tpu.memory_space<vmem>>, %arg2: memref<1x8x128xf32, #tpu.memory_space<vmem>>, %arg3: memref<1x1x128xf32, #tpu.memory_space<vmem>>, %arg4: memref<1x1x128xf32, #tpu.memory_space<vmem>>) attributes {dimension_semantics = [#tpu.dimension_semantics<parallel>], iteration_bounds = array<i64: 2>, scalar_prefetch = 0 : i64, scratch_operands = 0 : i64, tpu.core_type = #tpu.core_type<tc>, window_params = [{transform_indices = @transform_0, window_bounds = array<i64: 1, 8, 128>}, {transform_indices = @transform_1, window_bounds = array<i64: 1, 8, 128>}, {transform_indices = @transform_2, window_bounds = array<i64: 1, 1, 128>}, {transform_indices = @transform_3, window_bounds = array<i64: 1, 1, 128>}]} {
    %c0 = arith.constant 0 : index
    %c0_0 = arith.constant 0 : index
    %c0_1 = arith.constant 0 : index
    %0 = vector.load %arg1[%c0, %c0_0, %c0_1] : memref<1x8x128xf32, #tpu.memory_space<vmem>>, vector<1x8x128xf32>
    %c0_2 = arith.constant 0 : index
    %c0_3 = arith.constant 0 : index
    %c0_4 = arith.constant 0 : index
    %1 = vector.load %arg2[%c0_2, %c0_3, %c0_4] : memref<1x8x128xf32, #tpu.memory_space<vmem>>, vector<1x8x128xf32>
    %2 = arith.mulf %0, %1 : vector<1x8x128xf32>
    %cst = arith.constant dense<0.000000e+00> : vector<1x128xf32>
    %3 = vector.multi_reduction <add>, %2, %cst [1] : vector<1x8x128xf32> to vector<1x128xf32>
    %4 = vector.shape_cast %3 : vector<1x128xf32> to vector<1x1x128xf32>
    %c0_5 = arith.constant 0 : index
    %c0_6 = arith.constant 0 : index
    %c0_7 = arith.constant 0 : index
    %5 = vector.load %arg3[%c0_5, %c0_6, %c0_7] : memref<1x1x128xf32, #tpu.memory_space<vmem>>, vector<1x1x128xf32>
    tpu.vector_store %arg3[%c0_5, %c0_6, %c0_7], %4 {strides = array<i32>} : memref<1x1x128xf32, #tpu.memory_space<vmem>>, vector<1x1x128xf32>,
    %6 = arith.mulf %0, %0 : vector<1x8x128xf32>
    %7 = arith.mulf %1, %1 : vector<1x8x128xf32>
    %8 = arith.addf %6, %7 : vector<1x8x128xf32>
    %cst_8 = arith.constant dense<0.000000e+00> : vector<1x128xf32>
    %9 = vector.multi_reduction <add>, %8, %cst_8 [1] : vector<1x8x128xf32> to vector<1x128xf32>
    %10 = vector.shape_cast %9 : vector<1x128xf32> to vector<1x1x128xf32>
    %c0_9 = arith.constant 0 : index
    %c0_10 = arith.constant 0 : index
    %c0_11 = arith.constant 0 : index
    %11 = vector.load %arg4[%c0_9, %c0_10, %c0_11] : memref<1x1x128xf32, #tpu.memory_space<vmem>>, vector<1x1x128xf32>
    tpu.vector_store %arg4[%c0_9, %c0_10, %c0_11], %10 {strides = array<i32>} : memref<1x1x128xf32, #tpu.memory_space<vmem>>, vector<1x1x128xf32>,
    return
  }
  func.func @transform_0(%arg0: i32) -> (i32, i32, i32) {
    %c0_i32 = arith.constant 0 : i32
    %c0_i32_0 = arith.constant 0 : i32
    %c0_i32_1 = arith.constant 0 : i32
    return %arg0, %c0_i32, %c0_i32_0 : i32, i32, i32
  }
  func.func @transform_1(%arg0: i32) -> (i32, i32, i32) {
    %c0_i32 = arith.constant 0 : i32
    %c0_i32_0 = arith.constant 0 : i32
    %c0_i32_1 = arith.constant 0 : i32
    return %arg0, %c0_i32, %c0_i32_0 : i32, i32, i32
  }
  func.func @transform_2(%arg0: i32) -> (i32, i32, i32) {
    %c0_i32 = arith.constant 0 : i32
    %c0_i32_0 = arith.constant 0 : i32
    %c0_i32_1 = arith.constant 0 : i32
    return %arg0, %c0_i32, %c0_i32_0 : i32, i32, i32
  }
  func.func @transform_3(%arg0: i32) -> (i32, i32, i32) {
    %c0_i32 = arith.constant 0 : i32
    %c0_i32_0 = arith.constant 0 : i32
    %c0_i32_1 = arith.constant 0 : i32
    return %arg0, %c0_i32, %c0_i32_0 : i32, i32, i32
  }
}

</mosaic_0001>

<bundles_post_ra>
// kernel: tpu_custom_call.1
= control target key start
LH: loop header
LB: loop body
LE: loop exit
PB: predicated region body
PF: predicated region fallthrough
CT: control target
= control target key end

     0   :  { %9 = vsyncpa [#allocation3], 0  ;;  %s901_s0 = inlined_call_operand.hbm [shape: f32[2,8,128], index: 0, kind: input, shape index: {}]   ;;  %s902_s1 = inlined_call_operand.hbm [shape: f32[2,8,128], index: 1, kind: input, shape index: {}]   ;;  %s903_s2 = inlined_call_operand.hbm [shape: f32[2,1,128], index: 2, kind: output, shape index: {0}]   ;;  %s904_s3 = inlined_call_operand.hbm [shape: f32[2,1,128], index: 3, kind: output, shape index: {1}]  }
   0x1   :  { %11 = vsyncpa [#allocation3 + $0x1], 0 }
   0x2   :  { %12 = vsyncpa [#allocation6], 0 }
   0x3   :  { %14 = vsyncpa [#allocation6 + $0x1], 0 }
   0x4   :  { %15 = vsyncpa [#allocation4], 0 }
   0x5   :  { %17 = vsyncpa [#allocation4 + $0x1], 0 }
   0x6   :  { %18 = vsyncpa [#allocation9], 0 }
   0x7   :  { %20 = vsyncpa [#allocation9 + $0x1], 0  ;;  %s657_s12 = smov 0   ;;  %s659_s13 = smov 0  }
   0x8   :  { %s661_s14 = smov 0   ;;  %s663_s15 = smov 0  }
   0x9 LB: > { %s678_s16 = sadd.s32 4294967295, %s631_s15   ;;  %s399_s17 = sadd.s32 4294967294, %s631_s15   ;;  %s631_s15 = sphi %s663_s15, %s923_s15   ;;  %s627_s14 = sphi %s661_s14, %s922_s14   ;;  %s623_s13 = sphi %s659_s13, %s921_s13   ;;  %s619_s12 = sphi %s657_s12, %s920_s12  }
   0xa   : > { %s682_s18 = sadd.s32 1, %s631_s15   ;;  %s33_s19 = sadd.s32 1, %s627_s14 }
   0xb   : > { %s30_s20 = ssub.s32 %s631_s15, %s682_s18  ;;  %p40_p0 = scmp.ne.s32.totalorder %s627_s14, %s623_s13 }
   0xc   : > { %p31_p1 = scmp.eq.s32.totalorder %s30_s20, 0  ;;  %p41_p2 = scmp.eq.s32.totalorder %s631_s15, 0 }
   0xd   : > { %p46_p3 = scmp.ne.s32.totalorder %s623_s13, %s619_s12  ;;  %p47_p4 = scmp.eq.s32.totalorder %s678_s16, 0 }
   0xe   : > { %s694_s21 = scalar_select %p31_p1, %s627_s14, %s33_s19  }
   0xf   : > { %p696_p5 = por %p41_p2, %p40_p0  ;;  %p700_p6 = por %p47_p4, %p46_p3 }
  0x10   : > { %p96_p7 = scmp.eq.s32.totalorder %s678_s16, 1  ;;  %p102_p8 = scmp.eq.s32.totalorder %s399_s17, 1 }
  0x11   : > { %s908_s23 = scalar_select %p700_p6, 1, 0 }
  0x12   : > { %p435_p10 = scmp.lt.s32.totalorder %s631_s15, 2  ;;  %p707_p11 = por %p96_p7, %p40_p0 }
  0x13   : > { %p711_p12 = por %p102_p8, %p46_p3  ;;  %s716_s26 = sand.u32 1, %s627_s14  }
  0x14   : > { %s909_s24 = scalar_select %p707_p11, 1, 0 }
  0x15   : > { %s910_s25 = scalar_select %p711_p12, 1, 0 }
  0x16   : > { %s403_s27 = sshll.u32 %s631_s15, 7  ;;  %s402_s28 = sshll.u32 %s716_s26, 3 }
  0x17   : > { %s725_s4 = scalar_lea.hbm %s901_s0, %s403_s27  ;;  %s152_s5 = scalar_lea.vmem [#allocation2], %s402_s28 }
  0x18   : > { %s159_s6 = sshll.u32 %s152_s5, 4  ;;  %p731_p13 = pnand %p435_p10, %p696_p5  ;;  %s735_s6 = int_to_ptr.vmem [resolvable:$true] %s159_s6 }
  0x19   : > { %s149_s8 = scalar_lea.sflag [#allocation3], %s716_s26  ;;  %s469_s9 = scalar_lea.hbm %s725_s4, 128 }
  0x1a   : > { %p470_p2 = scmp.ne.s32.totalorder %s725_s4, %s469_s9  ;;  %p471_p3 = pneg %p731_p13 }
  0x1b   : > { %s474_s17 = scalar_lea.hbm %s901_s0, 256  ;;  %p475_p5 = scmp.lt.u32.totalorder %s725_s4, %s901_s0 }
  0x1c   : > { %p472_p4 = pnand %p471_p3, %p470_p2  ;;  %p476_p8 = scmp.lt.u32.totalorder %s474_s17, %s469_s9 }
  0x1d   : > { %p478_p9 = scmp.lt.u32.totalorder %s469_s9, %s725_s4 }
  0x1e   : > { %p473_p7 = pneg %p472_p4  ;;  %p477_p10 = por %p476_p8, %p475_p5 }
  0x20   : > { %p479_p0 = por %p478_p9, %p477_p10 }
  0x22   : > { %p480_p1 = pnand %p479_p0, %p473_p7 }
  0x24   : > { %483 = shalt.err (!%p480_p1)
}
  0x25   : > { %s484_s22 = scalar_lea.vmem %s735_s6, 128  ;;  %s633_s29 = smov [#allocation2]  }
  0x26   : > { %p485_p2 = scmp.ne.s32.totalorder %s735_s6, %s484_s22  ;;  %s489_s30 = sshll.u32 %s633_s29, 4  ;;  %s490_s30 = int_to_ptr.vmem [resolvable:$false] %s489_s30 }
  0x27   : > { %s491_s5 = scalar_lea.vmem %s490_s30, 256  ;;  %p492_p11 = scmp.lt.s32.totalorder %s735_s6, %s490_s30 }
  0x28   : > { %p487_p4 = pnand %p485_p2, %p471_p3  ;;  %p493_p5 = scmp.lt.s32.totalorder %s491_s5, %s484_s22 }
  0x2a   : > { %p488_p12 = pneg %p487_p4  ;;  %p494_p8 = por %p493_p5, %p492_p11 }
  0x2c   : > { %p495_p9 = pnand %p494_p8, %p488_p12 }
  0x2e   : > { %498 = shalt.err (!%p495_p9)
}
  0x2f   : > { %424 = dma.hbm_to_vmem [thread:$0]  (!%p731_p13), %s725_s4, 128, %s735_s6, %s149_s8  }
  0x30   : > { %p912_p0 = scmp.lt.s32.totalorder %s631_s15, 3  ;;  %p913_p1 = scmp.ge.s32.totalorder %s631_s15, 1 }
  0x31   : > { %s778_s17 = scalar_lea.hbm %s902_s1, %s403_s27  ;;  %s170_s19 = scalar_lea.vmem [#allocation5], %s402_s28 }
  0x32   : > { %p769_p7 = pnand %p913_p1, %p912_p0  ;;  %s177_s20 = sshll.u32 %s170_s19, 4  ;;  %s178_s20 = int_to_ptr.vmem [resolvable:$true] %s177_s20 }
  0x33   : > { %s167_s4 = scalar_lea.sflag [#allocation6], %s716_s26  ;;  %s499_s6 = scalar_lea.hbm %s778_s17, 128 }
  0x34   : > { %s914_s9 = scalar_select %p769_p7, 1, 0 }
  0x35   : > { %p500_p11 = scmp.ne.s32.totalorder %s778_s17, %s499_s6  ;;  %s504_s27 = scalar_lea.hbm %s902_s1, 256 }
  0x36   : > { %p505_p2 = scmp.lt.u32.totalorder %s778_s17, %s902_s1  ;;  %p506_p4 = scmp.lt.u32.totalorder %s504_s27, %s499_s6 }
  0x37   : > { %p502_p12 = pnand %p500_p11, %p471_p3  ;;  %p508_p8 = scmp.lt.u32.totalorder %s499_s6, %s778_s17 }
  0x38   : > { %p507_p5 = por %p506_p4, %p505_p2 }
  0x39   : > { %p503_p10 = pneg %p502_p12 }
  0x3a   : > { %p509_p9 = por %p508_p8, %p507_p5 }
  0x3c   : > { %p510_p0 = pnand %p509_p9, %p503_p10 }
  0x3e   : > { %513 = shalt.err (!%p510_p0)
}
  0x3f   : > { %s514_s26 = scalar_lea.vmem %s178_s20, 128  ;;  %s634_s28 = smov [#allocation5]  }
  0x40   : > { %p515_p1 = scmp.ne.s32.totalorder %s178_s20, %s514_s26  ;;  %s519_s5 = sshll.u32 %s634_s28, 4  ;;  %s520_s5 = int_to_ptr.vmem [resolvable:$false] %s519_s5 }
  0x41   : > { %s521_s10 = scalar_lea.vmem %s520_s5, 256  ;;  %p522_p6 = scmp.lt.s32.totalorder %s178_s20, %s520_s5 }
  0x42   : > { %p517_p11 = pnand %p515_p1, %p471_p3  ;;  %p523_p7 = scmp.lt.s32.totalorder %s521_s10, %s514_s26 }
  0x44   : > { %p518_p12 = pneg %p517_p11  ;;  %p524_p2 = por %p523_p7, %p522_p6 }
  0x46   : > { %p525_p4 = pnand %p524_p2, %p518_p12 }
  0x48   : > { %528 = shalt.err (!%p525_p4)
}
  0x49   : > { %427 = dma.hbm_to_vmem [thread:$0]  (!%p731_p13), %s778_s17, 128, %s178_s20, %s167_s4  }
  0x4a   : > { %p915_p10 = scmp.ne.s32.totalorder %s914_s9, 0 }
  0x4b   : > { %s805_s11 = sand.u32 (!%p915_p10), 1, %s623_s13   ;;  %p916_p3 = scmp.ne.s32.totalorder (!%p915_p10), %s908_s23, 0 }
  0x4c   : > { %186 = sbr.rel (%p915_p10) target bundleno = 138 (0x8a), region = 28  ;;  %s407_s19 = sshll.u32 (!%p915_p10), %s805_s11, 3 }
  0x4d   : > { %s189_s6 = scalar_lea.sflag (!%p915_p10), [#allocation3], %s805_s11  ;;  %s192_s8 = scalar_lea.vmem (!%p915_p10), [#allocation2], %s407_s19 }
  0x53   : > { %602 = dma.done.wait (%p916_p3), %s189_s6, 128  }
  0x54   : > { %604 = vsyncadd (%p916_p3), %s189_s6, 4294967168  ;;  %s198_s7 = scalar_lea.sflag [#allocation6], %s805_s11  ;;  %s201_s17 = scalar_lea.vmem [#allocation5], %s407_s19 }
  0x55   : > { %606 = dma.done.wait (%p916_p3), %s198_s7, 128  }
  0x56   : > { %608 = vsyncadd (%p916_p3), %s198_s7, 4294967168  ;;  %v232_v0 = vld [vmem:[%s192_s8] sm:$0xff]  ;;  %v233_v1 = vld [vmem:[%s201_s17] sm:$0xff]  ;;  %s225_s9 = scalar_lea.vmem [#allocation7], %s805_s11  ;;  %s409_s20 = sshll.u32 %s678_s16, 4 }
  0x57   : > { %v234_v2 = vmul.f32 %v233_v1, %v232_v0  ;;  %v242_v3 = vmul.f32 %v232_v0, %v232_v0  ;;  %v243_v4 = vmul.f32 %v233_v1, %v233_v1  ;;  %s269_s23 = sshll.u32 %s225_s9, 4  ;;  %s231_s4 = scalar_lea.vmem [#allocation8], %s805_s11  ;;  %s823_s23 = int_to_ptr.vmem [resolvable:$true] %s269_s23 }
  0x58   : > { %s282_s22 = sshll.u32 %s231_s4, 4  ;;  %s828_s30 = scalar_lea.hbm %s903_s2, %s409_s20  ;;  %s830_s22 = int_to_ptr.vmem [resolvable:$true] %s282_s22 }
  0x59   : > { %v235_v5 = vrot.slane %v234_v2, 4  ;;  %v244_v6 = vadd.f32 %v243_v4, %v242_v3  ;;  %s835_s28 = scalar_lea.hbm %s904_s3, %s409_s20  ;;  %s253_s5 = scalar_lea.sflag [#allocation4], %s805_s11 }
  0x5a   : > { %s529_s10 = scalar_lea.vmem %s823_s23, 16  ;;  %p917_p13 = scmp.ne.s32.totalorder %s909_s24, 0 }
  0x5b   : > { %v236_v7 = vadd.f32 %v235_v5, %v234_v2  ;;  %v245_v8 = vrot.slane %v244_v6, 4  ;;  %p530_p6 = scmp.ne.s32.totalorder %s823_s23, %s529_s10  ;;  %s635_s19 = smov [#allocation7]  }
  0x5c   : > { %s533_s6 = sshll.u32 %s635_s19, 4  ;;  %s534_s6 = int_to_ptr.vmem [resolvable:$false] %s533_s6 }
  0x5d   : > { %v237_v9 = vrot.slane %v236_v7, 2  ;;  %v246_v10 = vadd.f32 %v245_v8, %v244_v6  ;;  %p531_p7 = pnand %p530_p6, %p917_p13  ;;  %s535_s8 = scalar_lea.vmem %s534_s6, 32 }
  0x5e   : > { %p536_p8 = scmp.lt.s32.totalorder %s823_s23, %s534_s6  ;;  %p537_p9 = scmp.lt.s32.totalorder %s535_s8, %s529_s10 }
  0x5f   : > { %v238_v11 = vadd.f32 %v237_v9, %v236_v7  ;;  %v247_v12 = vrot.slane %v246_v10, 2  ;;  %p532_p5 = pneg %p531_p7 }
  0x60   : > { %p538_p0 = por %p537_p9, %p536_p8 }
  0x61   : > { %v239_v13 = vrot.slane %v238_v11, 1  ;;  %v248_v14 = vadd.f32 %v247_v12, %v246_v10 }
  0x62   : > { %p539_p1 = pnand %p538_p0, %p532_p5 }
  0x63   : > { %v240_v15 = vadd.f32 %v239_v13, %v238_v11  ;;  %v249_v16 = vrot.slane %v248_v14, 1 }
  0x65   : > { %241 = vst [vmem:[%s225_s9] sm:$0x1] %v240_v15  ;;  %v250_v17 = vadd.f32 %v249_v16, %v248_v14 }
  0x66   : > { %542 = shalt.err (!%p539_p1)
}
  0x67   : > { %s543_s7 = scalar_lea.hbm %s828_s30, 16  ;;  %s547_s20 = scalar_lea.hbm %s903_s2, 32 }
  0x68   : > { %p544_p11 = scmp.ne.s32.totalorder %s828_s30, %s543_s7  ;;  %p548_p4 = scmp.lt.u32.totalorder %s828_s30, %s903_s2 }
  0x69   : > { %p549_p10 = scmp.lt.u32.totalorder %s547_s20, %s543_s7  ;;  %p551_p6 = scmp.lt.u32.totalorder %s543_s7, %s828_s30 }
  0x6a   : > { %p545_p12 = pnand %p544_p11, %p917_p13 }
  0x6b   : > { %p550_p3 = por %p549_p10, %p548_p4 }
  0x6c   : > { %p546_p2 = pneg %p545_p12 }
  0x6d   : > { %p552_p7 = por %p551_p6, %p550_p3 }
  0x6f   : > { %p553_p5 = pnand %p552_p7, %p546_p2 }
  0x71   : > { %556 = shalt.err (!%p553_p5)
}
  0x72   : > { %417 = dma.vmem_to_hbm [thread:$0]  (%p917_p13), %s823_s23, 16, %s828_s30, %s253_s5   ;;  %251 = vst [vmem:[%s231_s4] sm:$0x1] %v250_v17 }
  0x73   : > { %s257_s16 = scalar_lea.sflag [#allocation9], %s805_s11  ;;  %s557_s26 = scalar_lea.vmem %s830_s22, 16 }
  0x74   : > { %p558_p8 = scmp.ne.s32.totalorder %s830_s22, %s557_s26  ;;  %s636_s10 = smov [#allocation8]  }
  0x75   : > { %s561_s19 = sshll.u32 %s636_s10, 4  ;;  %s562_s19 = int_to_ptr.vmem [resolvable:$false] %s561_s19 }
  0x76   : > { %p559_p9 = pnand %p558_p8, %p917_p13  ;;  %s563_s6 = scalar_lea.vmem %s562_s19, 32 }
  0x77   : > { %p564_p1 = scmp.lt.s32.totalorder %s830_s22, %s562_s19  ;;  %p565_p11 = scmp.lt.s32.totalorder %s563_s6, %s557_s26 }
  0x78   : > { %p560_p0 = pneg %p559_p9 }
  0x79   : > { %p566_p12 = por %p565_p11, %p564_p1 }
  0x7b   : > { %p567_p2 = pnand %p566_p12, %p560_p0 }
  0x7d   : > { %570 = shalt.err (!%p567_p2)
}
  0x7e   : > { %s571_s11 = scalar_lea.hbm %s835_s28, 16  ;;  %s575_s30 = scalar_lea.hbm %s904_s3, 32 }
  0x7f   : > { %p572_p4 = scmp.ne.s32.totalorder %s835_s28, %s571_s11  ;;  %p576_p6 = scmp.lt.u32.totalorder %s835_s28, %s904_s3 }
  0x80   : > { %p577_p7 = scmp.lt.u32.totalorder %s575_s30, %s571_s11  ;;  %p579_p8 = scmp.lt.u32.totalorder %s571_s11, %s835_s28 }
  0x81   : > { %p573_p10 = pnand %p572_p4, %p917_p13 }
  0x82   : > { %p578_p5 = por %p577_p7, %p576_p6 }
  0x83   : > { %p574_p3 = pneg %p573_p10 }
  0x84   : > { %p580_p9 = por %p579_p8, %p578_p5 }
  0x86   : > { %p581_p0 = pnand %p580_p9, %p574_p3 }
  0x88   : > { %584 = shalt.err (!%p581_p0)
}
  0x89   : > { %418 = dma.vmem_to_hbm [thread:$0]  (%p917_p13), %s830_s22, 16, %s835_s28, %s257_s16  }
  0x8a PF: > { %s294_s7 = sand.u32 1, %s619_s12   ;;  %p918_p1 = scmp.ne.s32.totalorder %s910_s25, 0 }
  0x8b   : > { %p919_p11 = scmp.ge.s32.totalorder %s631_s15, 2  ;;  %s295_s17 = scalar_lea.sflag [#allocation4], %s294_s7 }
  0x8d   : > { %p429_p12 = pnand %p919_p11, %p918_p1 }
  0x8f   : > { %610 = dma.done.wait (!%p429_p12), %s295_s17, 16  }
  0x90   : > { %612 = vsyncadd (!%p429_p12), %s295_s17, 4294967280  ;;  %s303_s9 = scalar_lea.sflag [#allocation9], %s294_s7 }
  0x91   : > { %614 = dma.done.wait (!%p429_p12), %s303_s9, 16  }
  0x92   : > { %616 = vsyncadd (!%p429_p12), %s303_s9, 4294967280  ;;  %p23_p13 = scmp.ge.s32.totalorder %s682_s18, 4   ;;  %s920_s12 = smov %s623_s13 }
  0x93   : > { %s921_s13 = smov %s627_s14  ;;  %s922_s14 = smov %s694_s21 }
  0x94   : > { %s923_s15 = smov %s682_s18  ;;  %25 = sbr.rel (!%p23_p13) target bundleno = 9 (0x9), region = 103 }
  0x9b   :  { %307 = vsyncpa [#allocation3], 1 }
  0x9c   :  { %309 = vsyncpa [#allocation3 + $0x1], 1 }
  0x9d   :  { %310 = vsyncpa [#allocation6], 1 }
  0x9e   :  { %312 = vsyncpa [#allocation6 + $0x1], 1 }
  0x9f   :  { %313 = vsyncpa [#allocation4], 1 }
  0xa0   :  { %315 = vsyncpa [#allocation4 + $0x1], 1 }
  0xa1   :  { %316 = vsyncpa [#allocation9], 1 }
  0xa2   :  { %318 = vsyncpa [#allocation9 + $0x1], 1 }

</bundles_post_ra>
